<compile_context>
chip_gen: v5e
topology: v5e:2x2
jax: 0.10.0
libtpu: 0.0.40
codegen_flags: <defaults>
</compile_context>

<pallas_src>
import functools

import jax
import jax.numpy as jnp
from jax.experimental import pallas as pl
from jax.experimental.pallas import tpu as pltpu


BN_EPS = 1e-5   # PyTorch BatchNorm1d default
LANE = 128      # TPU vreg lane width


def _round_up(v, m):
    return (v + m - 1) // m * m


# ------------------------------------------------------------------ fused kernel

def _make_fused_kernel(num_hidden, use_bf16):
    """num_hidden x (Linear[no bias] -> BN(batch stats) -> ReLU) + final Linear.

    Dropout has p=0.0 (module default) -> identity, so it is omitted.
    Hidden Linear biases are omitted: exactly cancelled by train-mode BN mean.
    Ref order: x, w0, [w_stack], gb, w_last, b_last, out.
    """
    has_stack = num_hidden > 1

    def matmul(a, b):
        if use_bf16:
            a = a.astype(jnp.bfloat16)
            b = b.astype(jnp.bfloat16)
        return jnp.dot(a, b, preferred_element_type=jnp.float32)

    def kernel(*refs):
        if has_stack:
            x_ref, w0_ref, wstack_ref, gb_ref, wl_ref, bl_ref, o_ref = refs
        else:
            x_ref, w0_ref, gb_ref, wl_ref, bl_ref, o_ref = refs
            wstack_ref = None

        h = x_ref[...].astype(jnp.float32)
        inv_n = 1.0 / h.shape[0]

        for layer in range(num_hidden):
            w = w0_ref[...] if layer == 0 else wstack_ref[layer - 1]
            z = matmul(h, w)                                   # MXU (bias dropped)
            # Single-pass train-mode BatchNorm folded into scale/shift.
            s1 = jnp.sum(z, axis=0, keepdims=True)
            s2 = jnp.sum(z * z, axis=0, keepdims=True)
            mean = s1 * inv_n
            var = jnp.maximum(s2 * inv_n - mean * mean, 0.0)   # biased batch var
            gb = gb_ref[layer]                                 # (2, hid_p): [gamma; beta]
            scale = gb[0:1, :] * jax.lax.rsqrt(var + BN_EPS)   # rsqrt -> EUP slot
            shift = gb[1:2, :] - mean * scale
            h = jnp.maximum(z * scale + shift, 0.0)            # ReLU; Dropout(p=0) omitted

        out = matmul(h, wl_ref[...]) + bl_ref[...]
        o_ref[...] = out.astype(o_ref.dtype)

    return kernel


# ------------------------------------------------------------------ one-time packing

def pack_params(params, bn_params):
    """Pad lane dims to multiples of 128 and pack operands ONCE (call outside jit).

    Hidden-layer biases are intentionally dropped (cancelled by train-mode BN).
    gamma is padded with 0 so padded lanes get scale=0 and stay exactly 0.
    """
    in_dim, hid_dim = params[0][0].shape
    out_dim = params[-1][0].shape[1]
    in_p, hid_p, out_p = (_round_up(d, LANE) for d in (in_dim, hid_dim, out_dim))
    num_hidden = len(params) - 1

    w0 = jnp.pad(params[0][0], ((0, in_p - in_dim), (0, hid_p - hid_dim)))

    w_stack = None
    if num_hidden > 1:
        w_stack = jnp.stack([
            jnp.pad(w, ((0, hid_p - hid_dim), (0, hid_p - hid_dim)))
            for (w, _) in params[1:-1]
        ])                                                     # (num_hidden-1, hid_p, hid_p)

    gb = jnp.stack([
        jnp.concatenate([
            jnp.pad(g, ((0, 0), (0, hid_p - hid_dim))),        # gamma pad = 0
            jnp.pad(be, ((0, 0), (0, hid_p - hid_dim))),       # beta  pad = 0
        ], axis=0)
        for (g, be) in bn_params
    ])                                                         # (num_hidden, 2, hid_p)

    w_last, b_last = params[-1]
    wl = jnp.pad(w_last, ((0, hid_p - hid_dim), (0, out_p - out_dim)))
    bl = jnp.pad(b_last, ((0, 0), (0, out_p - out_dim)))

    return {"w0": w0, "w_stack": w_stack, "gb": gb, "w_last": wl, "b_last": bl}


# ------------------------------------------------------------------ forward wrapper

@functools.partial(jax.jit, static_argnames=("out_dim",))
def classifier_forward(x, packed, *, out_dim):
    n, in_dim = x.shape
    in_p, hid_p = packed["w0"].shape
    out_p = packed["w_last"].shape[1]
    num_hidden = packed["gb"].shape[0]

    # Only the per-call activation is padded here; parameters were padded once.
    x_p = jnp.pad(x, ((0, 0), (0, in_p - in_dim)))

    # bf16 MXU operands only once shapes become MXU-relevant (negligible below).
    use_bf16 = (hid_p >= 512) and (n >= 128)

    ops = [x_p, packed["w0"]]
    if packed["w_stack"] is not None:
        ops.append(packed["w_stack"])
    ops += [packed["gb"], packed["w_last"], packed["b_last"]]

    flops = (2 * n * in_p * hid_p
             + 2 * n * hid_p * hid_p * (num_hidden - 1)
             + 2 * n * hid_p * out_p)
    bytes_accessed = sum(int(op.size) * op.dtype.itemsize for op in ops) + n * out_p * 4

    vmem = pl.BlockSpec(memory_space=pltpu.MemorySpace.VMEM)
    kernel = _make_fused_kernel(num_hidden, use_bf16)

    out_padded = pl.pallas_call(
        kernel,
        out_shape=jax.ShapeDtypeStruct((n, out_p), jnp.float32),
        in_specs=[vmem] * len(ops),
        out_specs=vmem,
        compiler_params=pltpu.CompilerParams(vmem_limit_bytes=32 << 20),
        cost_estimate=pl.CostEstimate(
            flops=int(flops),
            transcendentals=int(num_hidden * hid_p),
            bytes_accessed=int(bytes_accessed),
        ),
    )(*ops)

    # Drop padded output lanes outside the kernel (keeps in-kernel stores lane-dense).
    return out_padded[:, :out_dim]


# ------------------------------------------------------------------ parameter init
# (deterministic, mimics nn.Linear.reset_parameters / nn.BatchNorm1d.reset_parameters)

def init_params(key, in_dim, hid_dim, out_dim, num_layers=2):
    assert num_layers >= 2
    dims = [in_dim] + [hid_dim] * (num_layers - 1) + [out_dim]
    params = []
    for i in range(num_layers):
        fan_in, fan_out = dims[i], dims[i + 1]
        key, kw, kb = jax.random.split(key, 3)
        bound = 1.0 / jnp.sqrt(fan_in)
        # stored pre-transposed: [in, out]
        w = jax.random.uniform(kw, (fan_in, fan_out), jnp.float32, -bound, bound)
        b = jax.random.uniform(kb, (1, fan_out), jnp.float32, -bound, bound)
        params.append((w, b))
    # BatchNorm1d: gamma=1, beta=0 after reset_parameters()
    bn_params = [
        (jnp.ones((1, hid_dim), jnp.float32), jnp.zeros((1, hid_dim), jnp.float32))
        for _ in range(num_layers - 1)
    ]
    return params, bn_params


# ------------------------------------------------------------------ reference (pure JAX, faithful to PyTorch)

def classifier_reference(x, params, bn_params):
    h = x
    for (w, b), (gamma, beta) in zip(params[:-1], bn_params):
        z = h @ w + b                       # bias kept here; cancelled analytically by BN
        mean = jnp.mean(z, axis=0, keepdims=True)
        var = jnp.mean((z - mean) ** 2, axis=0, keepdims=True)
        z = (z - mean) / jnp.sqrt(var + BN_EPS) * gamma + beta
        h = jnp.maximum(z, 0.0)
    w, b = params[-1]
    return h @ w + b


# ------------------------------------------------------------------ main

if __name__ == "__main__":
    key = jax.random.PRNGKey(0)
    k_x, k_p = jax.random.split(key)

    batch, in_dim, hid_dim, out_dim, num_layers = 8, 32, 32, 8, 3

    x = jax.random.normal(k_x, (batch, in_dim), jnp.float32)
    params, bn_params = init_params(k_p, in_dim, hid_dim, out_dim, num_layers)

    # Pad/pack parameters once (outside the jitted per-call path).
    packed = pack_params(params, bn_params)

    out = classifier_forward(x, packed, out_dim=out_dim)
    out = jax.block_until_ready(out)

    ref = classifier_reference(x, params, bn_params)
    assert out.shape == (batch, out_dim)
    assert jnp.allclose(out, ref, atol=1e-4, rtol=1e-4), "Pallas output mismatch vs reference"

    print("KERNEL_OK")
</pallas_src>

<mosaic_0001>
module attributes {stable_mosaic.version = 11 : i64} {
  func.func @kernel(%arg0: memref<8x128xf32, #tpu.memory_space<vmem>>, %arg1: memref<128x128xf32, #tpu.memory_space<vmem>>, %arg2: memref<1x128x128xf32, #tpu.memory_space<vmem>>, %arg3: memref<2x2x128xf32, #tpu.memory_space<vmem>>, %arg4: memref<128x128xf32, #tpu.memory_space<vmem>>, %arg5: memref<1x128xf32, #tpu.memory_space<vmem>>, %arg6: memref<8x128xf32, #tpu.memory_space<vmem>>) attributes {dimension_semantics = [], scalar_prefetch = 0 : i64, scratch_operands = 0 : i64, tpu.core_type = #tpu.core_type<tc>} {
    %c0 = arith.constant 0 : index
    %c0_0 = arith.constant 0 : index
    %0 = vector.load %arg0[%c0, %c0_0] : memref<8x128xf32, #tpu.memory_space<vmem>>, vector<8x128xf32>
    %c0_1 = arith.constant 0 : index
    %c0_2 = arith.constant 0 : index
    %1 = vector.load %arg1[%c0_1, %c0_2] : memref<128x128xf32, #tpu.memory_space<vmem>>, vector<128x128xf32>
    %cst = arith.constant dense<0.000000e+00> : vector<8x128xf32>
    %2 = tpu.matmul %0, %1, %cst {dimension_numbers = #tpu.dot_dimension_numbers<[1], [0], [0], [1], [0, 0, 1, 1], [], []>} : vector<8x128xf32>, vector<128x128xf32>, vector<8x128xf32> -> vector<8x128xf32>
    %cst_3 = arith.constant dense<0.000000e+00> : vector<128xf32>
    %3 = vector.multi_reduction <add>, %2, %cst_3 [0] : vector<8x128xf32> to vector<128xf32>
    %4 = vector.shape_cast %3 : vector<128xf32> to vector<1x128xf32>
    %5 = arith.mulf %2, %2 : vector<8x128xf32>
    %cst_4 = arith.constant dense<0.000000e+00> : vector<128xf32>
    %6 = vector.multi_reduction <add>, %5, %cst_4 [0] : vector<8x128xf32> to vector<128xf32>
    %7 = vector.shape_cast %6 : vector<128xf32> to vector<1x128xf32>
    %cst_5 = arith.constant 1.250000e-01 : f32
    %8 = vector.broadcast %cst_5 : f32 to vector<1x128xf32>
    %9 = arith.mulf %4, %8 : vector<1x128xf32>
    %cst_6 = arith.constant 1.250000e-01 : f32
    %10 = vector.broadcast %cst_6 : f32 to vector<1x128xf32>
    %11 = arith.mulf %7, %10 : vector<1x128xf32>
    %12 = arith.mulf %9, %9 : vector<1x128xf32>
    %13 = arith.subf %11, %12 : vector<1x128xf32>
    %cst_7 = arith.constant 0.000000e+00 : f32
    %14 = vector.broadcast %cst_7 : f32 to vector<1x128xf32>
    %15 = arith.maximumf %13, %14 : vector<1x128xf32>
    %c0_8 = arith.constant 0 : index
    %c0_9 = arith.constant 0 : index
    %c0_10 = arith.constant 0 : index
    %16 = vector.load %arg3[%c0_8, %c0_9, %c0_10] : memref<2x2x128xf32, #tpu.memory_space<vmem>>, vector<1x2x128xf32>
    %17 = vector.shape_cast %16 : vector<1x2x128xf32> to vector<2x128xf32>
    %18 = vector.extract_strided_slice %17 {offsets = [0, 0], sizes = [1, 128], strides = [1, 1]} : vector<2x128xf32> to vector<1x128xf32>
    %cst_11 = arith.constant 9.99999974E-6 : f32
    %19 = vector.broadcast %cst_11 : f32 to vector<1x128xf32>
    %20 = arith.addf %15, %19 : vector<1x128xf32>
    %21 = math.rsqrt %20 : vector<1x128xf32>
    %22 = arith.mulf %18, %21 : vector<1x128xf32>
    %23 = vector.extract_strided_slice %17 {offsets = [1, 0], sizes = [1, 128], strides = [1, 1]} : vector<2x128xf32> to vector<1x128xf32>
    %24 = arith.mulf %9, %22 : vector<1x128xf32>
    %25 = arith.subf %23, %24 : vector<1x128xf32>
    %26 = vector.broadcast %22 : vector<1x128xf32> to vector<8x128xf32>
    %27 = arith.mulf %2, %26 : vector<8x128xf32>
    %28 = vector.broadcast %25 : vector<1x128xf32> to vector<8x128xf32>
    %29 = arith.addf %27, %28 : vector<8x128xf32>
    %cst_12 = arith.constant 0.000000e+00 : f32
    %30 = vector.broadcast %cst_12 : f32 to vector<8x128xf32>
    %31 = arith.maximumf %29, %30 : vector<8x128xf32>
    %c0_13 = arith.constant 0 : index
    %c0_14 = arith.constant 0 : index
    %c0_15 = arith.constant 0 : index
    %32 = vector.load %arg2[%c0_13, %c0_14, %c0_15] : memref<1x128x128xf32, #tpu.memory_space<vmem>>, vector<1x128x128xf32>
    %33 = vector.shape_cast %32 : vector<1x128x128xf32> to vector<128x128xf32>
    %cst_16 = arith.constant dense<0.000000e+00> : vector<8x128xf32>
    %34 = tpu.matmul %31, %33, %cst_16 {dimension_numbers = #tpu.dot_dimension_numbers<[1], [0], [0], [1], [0, 0, 1, 1], [], []>} : vector<8x128xf32>, vector<128x128xf32>, vector<8x128xf32> -> vector<8x128xf32>
    %cst_17 = arith.constant dense<0.000000e+00> : vector<128xf32>
    %35 = vector.multi_reduction <add>, %34, %cst_17 [0] : vector<8x128xf32> to vector<128xf32>
    %36 = vector.shape_cast %35 : vector<128xf32> to vector<1x128xf32>
    %37 = arith.mulf %34, %34 : vector<8x128xf32>
    %cst_18 = arith.constant dense<0.000000e+00> : vector<128xf32>
    %38 = vector.multi_reduction <add>, %37, %cst_18 [0] : vector<8x128xf32> to vector<128xf32>
    %39 = vector.shape_cast %38 : vector<128xf32> to vector<1x128xf32>
    %cst_19 = arith.constant 1.250000e-01 : f32
    %40 = vector.broadcast %cst_19 : f32 to vector<1x128xf32>
    %41 = arith.mulf %36, %40 : vector<1x128xf32>
    %cst_20 = arith.constant 1.250000e-01 : f32
    %42 = vector.broadcast %cst_20 : f32 to vector<1x128xf32>
    %43 = arith.mulf %39, %42 : vector<1x128xf32>
    %44 = arith.mulf %41, %41 : vector<1x128xf32>
    %45 = arith.subf %43, %44 : vector<1x128xf32>
    %cst_21 = arith.constant 0.000000e+00 : f32
    %46 = vector.broadcast %cst_21 : f32 to vector<1x128xf32>
    %47 = arith.maximumf %45, %46 : vector<1x128xf32>
    %c1 = arith.constant 1 : index
    %c0_22 = arith.constant 0 : index
    %c0_23 = arith.constant 0 : index
    %48 = vector.load %arg3[%c1, %c0_22, %c0_23] : memref<2x2x128xf32, #tpu.memory_space<vmem>>, vector<1x2x128xf32>
    %49 = vector.shape_cast %48 : vector<1x2x128xf32> to vector<2x128xf32>
    %50 = vector.extract_strided_slice %49 {offsets = [0, 0], sizes = [1, 128], strides = [1, 1]} : vector<2x128xf32> to vector<1x128xf32>
    %cst_24 = arith.constant 9.99999974E-6 : f32
    %51 = vector.broadcast %cst_24 : f32 to vector<1x128xf32>
    %52 = arith.addf %47, %51 : vector<1x128xf32>
    %53 = math.rsqrt %52 : vector<1x128xf32>
    %54 = arith.mulf %50, %53 : vector<1x128xf32>
    %55 = vector.extract_strided_slice %49 {offsets = [1, 0], sizes = [1, 128], strides = [1, 1]} : vector<2x128xf32> to vector<1x128xf32>
    %56 = arith.mulf %41, %54 : vector<1x128xf32>
    %57 = arith.subf %55, %56 : vector<1x128xf32>
    %58 = vector.broadcast %54 : vector<1x128xf32> to vector<8x128xf32>
    %59 = arith.mulf %34, %58 : vector<8x128xf32>
    %60 = vector.broadcast %57 : vector<1x128xf32> to vector<8x128xf32>
    %61 = arith.addf %59, %60 : vector<8x128xf32>
    %cst_25 = arith.constant 0.000000e+00 : f32
    %62 = vector.broadcast %cst_25 : f32 to vector<8x128xf32>
    %63 = arith.maximumf %61, %62 : vector<8x128xf32>
    %c0_26 = arith.constant 0 : index
    %c0_27 = arith.constant 0 : index
    %64 = vector.load %arg4[%c0_26, %c0_27] : memref<128x128xf32, #tpu.memory_space<vmem>>, vector<128x128xf32>
    %cst_28 = arith.constant dense<0.000000e+00> : vector<8x128xf32>
    %65 = tpu.matmul %63, %64, %cst_28 {dimension_numbers = #tpu.dot_dimension_numbers<[1], [0], [0], [1], [0, 0, 1, 1], [], []>} : vector<8x128xf32>, vector<128x128xf32>, vector<8x128xf32> -> vector<8x128xf32>
    %c0_29 = arith.constant 0 : index
    %c0_30 = arith.constant 0 : index
    %66 = vector.load %arg5[%c0_29, %c0_30] : memref<1x128xf32, #tpu.memory_space<vmem>>, vector<1x128xf32>
    %67 = vector.broadcast %66 : vector<1x128xf32> to vector<8x128xf32>
    %68 = arith.addf %65, %67 : vector<8x128xf32>
    %c0_31 = arith.constant 0 : index
    %c0_32 = arith.constant 0 : index
    %69 = vector.load %arg6[%c0_31, %c0_32] : memref<8x128xf32, #tpu.memory_space<vmem>>, vector<8x128xf32>
    tpu.vector_store %arg6[%c0_31, %c0_32], %68 {strides = array<i32>} : memref<8x128xf32, #tpu.memory_space<vmem>>, vector<8x128xf32>,
    return
  }
}

</mosaic_0001>

<bundles_post_ra>
// kernel: classifier_forward.1
= control target key start
LH: loop header
LB: loop body
LE: loop exit
PB: predicated region body
PF: predicated region fallthrough
CT: control target
= control target key end

     0   :  { %11 = vsyncpa [#allocation3], 0  ;;  %s465_s0 = inlined_call_operand.vmem [shape: f32[8,128], index: 0, kind: input, shape index: {}]   ;;  %s466_s1 = inlined_call_operand.hbm [shape: f32[128,128], index: 1, kind: input, shape index: {}]   ;;  %s467_s2 = inlined_call_operand.hbm [shape: f32[1,128,128], index: 2, kind: input, shape index: {}]   ;;  %s468_s3 = inlined_call_operand.vmem [shape: f32[2,2,128], index: 3, kind: input, shape index: {}]   ;;  %s469_s4 = inlined_call_operand.hbm [shape: f32[128,128], index: 4, kind: input, shape index: {}]   ;;  %s470_s5 = inlined_call_operand.vmem [shape: f32[1,128], index: 5, kind: input, shape index: {}]   ;;  %s471_s6 = inlined_call_operand.hbm [shape: f32[8,128], index: 6, kind: output, shape index: {}]  }
   0x1   :  { %12 = vsyncpa [#allocation6], 0 }
   0x2   :  { %13 = vsyncpa [#allocation4], 0  ;;  %s33_s23 = sshll.u32 %s467_s2, 4  ;;  %s400_s24 = smov [#allocation5]   ;;  %s34_s23 = int_to_ptr.hbm [resolvable:$true] %s33_s23 }
   0x3   :  { %s35_s25 = sshll.u32 %s400_s24, 4  ;;  %s20_s28 = sshll.u32 %s466_s1, 4  ;;  %s36_s25 = int_to_ptr.vmem [resolvable:$true] %s35_s25  ;;  %s21_s28 = int_to_ptr.hbm [resolvable:$true] %s20_s28 }
   0x4   :  { %s401_s29 = smov 128   ;;  %s402_s30 = smov 8  }
   0x5   :  { %41 = dma.hbm_to_vmem [thread:$0]  %s34_s23, 2048, %s36_s25, [#allocation6], %s401_s29, %s401_s29, %s402_s30  }
   0x6   :  { %s403_s7 = smov [#allocation2]   ;;  %s48_s11 = sshll.u32 %s469_s4, 4  ;;  %s49_s11 = int_to_ptr.hbm [resolvable:$true] %s48_s11 }
   0x7   :  { %s22_s8 = sshll.u32 %s403_s7, 4  ;;  %s404_s2 = smov [#allocation7]   ;;  %s23_s8 = int_to_ptr.vmem [resolvable:$true] %s22_s8 }
   0x8   :  { %28 = dma.hbm_to_vmem [thread:$0]  %s21_s28, 2048, %s23_s8, [#allocation3], %s401_s29, %s401_s29, %s402_s30  }
   0x9   :  { %s50_s12 = sshll.u32 %s404_s2, 4  ;;  %s51_s12 = int_to_ptr.vmem [resolvable:$true] %s50_s12 }
   0xa   :  { %56 = dma.hbm_to_vmem [thread:$0]  %s49_s11, 2048, %s51_s12, [#allocation6], %s401_s29, %s401_s29, %s402_s30  }
   0xb   :  { %394 = dma.done.wait [#allocation3], 2048  }
   0xc   :  { %395 = vsyncadd [#allocation3], 4294965248 }
   0xd   :  { %396 = dma.done.wait [#allocation6], 4096  }
   0xe   :  { %397 = vsyncadd [#allocation6], 4294963200  ;;  %v87_v0 = vld [vmem:[#allocation2 + $0x78] sm:$0xff]  ;;  %v86_v1 = vld [vmem:[#allocation2 + $0x70] sm:$0xff]  ;;  %s405_s18 = smov [#allocation8]   ;;  %s275_s21 = sshll.u32 %s471_s6, 4  ;;  %s276_s21 = int_to_ptr.hbm [resolvable:$true] %s275_s21 }
   0xf   :  { %88 = vmatpush.msra.mxu0 %v87_v0  ;;  %v85_v2 = vld [vmem:[#allocation2 + $0x68] sm:$0xff]  ;;  %v84_v3 = vld [vmem:[#allocation2 + $0x60] sm:$0xff]  ;;  %v83_v4 = vld [vmem:[#allocation2 + $0x58] sm:$0xff] }
  0x10   :  { %v82_v5 = vld [vmem:[#allocation2 + $0x50] sm:$0xff]  ;;  %v81_v6 = vld [vmem:[#allocation2 + $0x48] sm:$0xff]  ;;  %v80_v7 = vld [vmem:[#allocation2 + $0x40] sm:$0xff] }
  0x11   :  { %89 = vmatpush.msra.mxu0 %v86_v1  ;;  %v79_v8 = vld [vmem:[#allocation2 + $0x38] sm:$0xff]  ;;  %v78_v9 = vld [vmem:[#allocation2 + $0x30] sm:$0xff]  ;;  %v77_v10 = vld [vmem:[#allocation2 + $0x28] sm:$0xff] }
  0x12   :  { %v76_v11 = vld [vmem:[#allocation2 + $0x20] sm:$0xff]  ;;  %v75_v12 = vld [vmem:[#allocation2 + $0x18] sm:$0xff]  ;;  %v74_v13 = vld [vmem:[#allocation2 + $0x10] sm:$0xff] }
  0x13   :  { %90 = vmatpush.msra.mxu0 %v85_v2  ;;  %v73_v14 = vld [vmem:[#allocation2 + $0x8] sm:$0xff]  ;;  %v72_v15 = vld [vmem:[#allocation2] sm:$0xff]  ;;  %v164_v17 = vld [vmem:[#allocation5 + $0x78] sm:$0xff] }
  0x14   :  { %v71_v16 = vld [vmem:[%s465_s0] sm:$0xff]  ;;  %165 = vmatpush.msra.mxu1 %v164_v17  ;;  %v163_v18 = vld [vmem:[#allocation5 + $0x70] sm:$0xff]  ;;  %v162_v19 = vld [vmem:[#allocation5 + $0x68] sm:$0xff] }
  0x15   :  { %91 = vmatpush.msra.mxu0 %v84_v3  ;;  %v161_v20 = vld [vmem:[#allocation5 + $0x60] sm:$0xff]  ;;  %v160_v21 = vld [vmem:[#allocation5 + $0x58] sm:$0xff]  ;;  %v159_v25 = vld [vmem:[#allocation5 + $0x50] sm:$0xff] }
  0x16   :  { %166 = vmatpush.msra.mxu1 %v163_v18  ;;  %v158_v28 = vld [vmem:[#allocation5 + $0x48] sm:$0xff]  ;;  %v157_v31 = vld [vmem:[#allocation5 + $0x40] sm:$0xff]  ;;  %v156_v34 = vld [vmem:[#allocation5 + $0x38] sm:$0xff] }
  0x17   :  { %92 = vmatpush.msra.mxu0 %v83_v4  ;;  %v155_v37 = vld [vmem:[#allocation5 + $0x30] sm:$0xff]  ;;  %v154_v40 = vld [vmem:[#allocation5 + $0x28] sm:$0xff]  ;;  %v153_v43 = vld [vmem:[#allocation5 + $0x20] sm:$0xff] }
  0x18   :  { %167 = vmatpush.msra.mxu1 %v162_v19  ;;  %v152_v44 = vld [vmem:[#allocation5 + $0x18] sm:$0xff]  ;;  %v151_v47 = vld [vmem:[#allocation5 + $0x10] sm:$0xff]  ;;  %v150_v49 = vld [vmem:[#allocation5 + $0x8] sm:$0xff] }
  0x19   :  { %93 = vmatpush.msra.mxu0 %v82_v5  ;;  %v149_v51 = vld [vmem:[#allocation5] sm:$0xff]  ;;  %v236_v17 = vld [vmem:[#allocation7 + $0x48] sm:$0xff] }
  0x1a   :  { %168 = vmatpush.msra.mxu1 %v161_v20  ;;  %v126_v58 = vld [vmem:[%s468_s3] sm:$0x3] }
  0x1b   :  { %94 = vmatpush.msra.mxu0 %v81_v6  ;;  %v242_v6 = vld [vmem:[#allocation7 + $0x78] sm:$0xff]  ;;  %v235_v20 = vld [vmem:[#allocation7 + $0x40] sm:$0xff] }
  0x1c   :  { %169 = vmatpush.msra.mxu1 %v160_v21  ;;  %247 = vmatpush.msra.mxu2 %v242_v6 }
  0x1d   :  { %95 = vmatpush.msra.mxu0 %v80_v7  ;;  %v241_v7 = vld [vmem:[#allocation7 + $0x70] sm:$0xff] }
  0x1e   :  { %170 = vmatpush.msra.mxu1 %v159_v25  ;;  %248 = vmatpush.msra.mxu2 %v241_v7 }
  0x1f   :  { %96 = vmatpush.msra.mxu0 %v79_v8  ;;  %v240_v8 = vld [vmem:[#allocation7 + $0x68] sm:$0xff] }
  0x20   :  { %171 = vmatpush.msra.mxu1 %v158_v28  ;;  %249 = vmatpush.msra.mxu2 %v240_v8 }
  0x21   :  { %97 = vmatpush.msra.mxu0 %v78_v9  ;;  %v239_v9 = vld [vmem:[#allocation7 + $0x60] sm:$0xff] }
  0x22   :  { %172 = vmatpush.msra.mxu1 %v157_v31  ;;  %250 = vmatpush.msra.mxu2 %v239_v9 }
  0x23   :  { %98 = vmatpush.msra.mxu0 %v77_v10  ;;  %v238_v10 = vld [vmem:[#allocation7 + $0x58] sm:$0xff] }
  0x24   :  { %173 = vmatpush.msra.mxu1 %v156_v34  ;;  %251 = vmatpush.msra.mxu2 %v238_v10 }
  0x25   :  { %99 = vmatpush.msra.mxu0 %v76_v11 }
  0x26   :  { %174 = vmatpush.msra.mxu1 %v155_v37 }
  0x27   :  { %100 = vmatpush.msra.mxu0 %v75_v12 }
  0x28   :  { %175 = vmatpush.msra.mxu1 %v154_v40  ;;  %v227_v40 = vld [vmem:[#allocation7] sm:$0xff] }
  0x29   :  { %101 = vmatpush.msra.mxu0 %v74_v13 }
  0x2a   :  { %176 = vmatpush.msra.mxu1 %v153_v43 }
  0x2b   :  { %102 = vmatpush.msra.mxu0 %v73_v14  ;;  %v237_v14 = vld [vmem:[#allocation7 + $0x50] sm:$0xff] }
  0x2c   :  { %177 = vmatpush.msra.mxu1 %v152_v44  ;;  %252 = vmatpush.msra.mxu2 %v237_v14 }
  0x2d   :  { %103 = vmatpush.msra.mxu0 %v72_v15 }
  0x2e   :  { %104 = vmatmul.f32.vlgmr.msra.gmra.mxu0 %v71_v16  ;;  %178 = vmatpush.msra.mxu1 %v151_v47  ;;  %v286_v47 = vld [vmem:[%s468_s3 + $0x2] sm:$0x3]  ;;  %s273_s3 = sshll.u32 %s405_s18, 4  ;;  %s274_s3 = int_to_ptr.vmem [resolvable:$true] %s273_s3 }
  0x2f   :  { %253 = vmatpush.msra.mxu2 %v236_v17 }
  0x30   :  { %179 = vmatpush.msra.mxu1 %v150_v49 }
  0x31   :  { %254 = vmatpush.msra.mxu2 %v235_v20 }
  0x32   :  { %180 = vmatpush.msra.mxu1 %v149_v51 }
  0xab   :  { %v105_v22 = vpop.f32.mrf.mxu0 }
  0xac   :  { %v108_v23 = vrot.slane %v105_v22, 4  ;;  %v114_v24 = vmul.f32 %v105_v22, %v105_v22 }
  0xae   :  { %v109_v26 = vadd.f32 %v108_v23, %v105_v22  ;;  %v115_v27 = vrot.slane %v114_v24, 4  ;;  %v234_v23 = vld [vmem:[#allocation7 + $0x38] sm:$0xff] }
  0xaf   :  { %255 = vmatpush.msra.mxu2 %v234_v23 }
  0xb0   :  { %v110_v29 = vrot.slane %v109_v26, 2  ;;  %v116_v30 = vadd.f32 %v115_v27, %v114_v24 }
  0xb2   :  { %v111_v32 = vadd.f32 %v110_v29, %v109_v26  ;;  %v117_v33 = vrot.slane %v116_v30, 2  ;;  %v233_v26 = vld [vmem:[#allocation7 + $0x30] sm:$0xff]  ;;  %v232_v29 = vld [vmem:[#allocation7 + $0x28] sm:$0xff] }
  0xb3   :  { %256 = vmatpush.msra.mxu2 %v233_v26 }
  0xb4   :  { %v112_v35 = vrot.slane %v111_v32, 1  ;;  %v118_v36 = vadd.f32 %v117_v33, %v116_v30  ;;  %v230_v33 = vld [vmem:[#allocation7 + $0x18] sm:$0xff] }
  0xb5   :  { %257 = vmatpush.msra.mxu2 %v232_v29 }
  0xb6   :  { %v113_v38 = vadd.f32 %v112_v35, %v111_v32  ;;  %v119_v39 = vrot.slane %v118_v36, 1  ;;  %v231_v32 = vld [vmem:[#allocation7 + $0x20] sm:$0xff] }
  0xb7   :  { %258 = vmatpush.msra.mxu2 %v231_v32 }
  0xb8   :  { %v120_v41 = vadd.f32 %v119_v39, %v118_v36  ;;  %v121_v42 = vmul.f32 0.125, %v113_v38  ;;  %v229_v36 = vld [vmem:[#allocation7 + $0x10] sm:$0xff]  ;;  %v228_v38 = vld [vmem:[#allocation7 + $0x8] sm:$0xff] }
  0xb9   :  { %259 = vmatpush.msra.mxu2 %v230_v33 }
  0xba   :  { %v122_v45 = vmul.f32 0.125, %v120_v41  ;;  %v123_v46 = vmul.f32 %v121_v42, %v121_v42 }
  0xbb   :  { %260 = vmatpush.msra.mxu2 %v229_v36 }
  0xbc   :  { %v124_v48 = vsub.f32 %v122_v45, %v123_v46 }
  0xbd   :  { %261 = vmatpush.msra.mxu2 %v228_v38 }
  0xbe   :  { %v125_v50 = vmax.f32 %v124_v48, 0.0 }
  0xbf   :  { %262 = vmatpush.msra.mxu2 %v227_v40 }
  0xc0   :  { %v127_v52 = vadd.f32 1e-05, %v125_v50 }
  0xc2   :  { %294 = vrsqrt.f32 %v127_v52  ;;  %vm134_vm1 = vweird.f32 %v127_v52 }
  0xc8   :  { %v295_v53 = vpop.eup %294 }
  0xc9   :  { %v129_v54 = vmul.f32 %v295_v53, %v127_v52  ;;  %vm135_vm0 = vweird.f32 %v295_v53 }
  0xca   :  { %vm136_vm2 = vmor %vm134_vm1, %vm135_vm0 }
  0xcb   :  { %v130_v55 = vmul.f32 %v295_v53, %v129_v54 }
  0xcd   :  { %v131_v56 = vmul.f32 0.5, %v130_v55 }
  0xcf   :  { %v132_v57 = vsub.f32 1.5, %v131_v56 }
  0xd1   :  { %v133_v59 = vmul.f32 %v295_v53, %v132_v57 }
  0xd3   :  { %v137_v60 = vsel %vm136_vm2, %v295_v53, %v133_v59  ;;  %v293_v59 = vld [vmem:[%s470_s5] ss:$0 sm:$0xff] }
  0xd4   :  { %v138_v61 = vmul.f32 %v137_v60, %v126_v58 }
  0xd6   :  { %v139_v62 = vmul.f32 %v138_v61, %v121_v42  ;;  %v144_v63 = vperm.slane %v138_v61, 0 }
  0xd8   :  { %v141_v0 = vrot.slane %v139_v62, 7  ;;  %v145_v2 = vmul.f32 %v144_v63, %v105_v22 }
  0xda   :  { %v143_v1 = vsub.f32 %v126_v58, %v141_v0 }
  0xdc   :  { %v146_v3 = vperm.slane %v143_v1, 1 }
  0xde   :  { %v147_v4 = vadd.f32 %v146_v3, %v145_v2 }
  0xe0   :  { %v148_v5 = vmax.f32 %v147_v4, 0.0 }
  0xe2   :  { %181 = vmatmul.f32.vlgmr.msra.gmra.mxu1 %v148_v5 }
 0x15f   :  { %v182_v11 = vpop.f32.mrf.mxu1 }
 0x160   :  { %v185_v12 = vrot.slane %v182_v11, 4  ;;  %v191_v13 = vmul.f32 %v182_v11, %v182_v11 }
 0x162   :  { %v186_v15 = vadd.f32 %v185_v12, %v182_v11  ;;  %v192_v16 = vrot.slane %v191_v13, 4 }
 0x164   :  { %v187_v18 = vrot.slane %v186_v15, 2  ;;  %v193_v19 = vadd.f32 %v192_v16, %v191_v13 }
 0x166   :  { %v188_v21 = vadd.f32 %v187_v18, %v186_v15  ;;  %v194_v22 = vrot.slane %v193_v19, 2 }
 0x168   :  { %v189_v24 = vrot.slane %v188_v21, 1  ;;  %v195_v25 = vadd.f32 %v194_v22, %v193_v19 }
 0x16a   :  { %v190_v27 = vadd.f32 %v189_v24, %v188_v21  ;;  %v196_v28 = vrot.slane %v195_v25, 1 }
 0x16c   :  { %v197_v30 = vadd.f32 %v196_v28, %v195_v25  ;;  %v198_v31 = vmul.f32 0.125, %v190_v27 }
 0x16e   :  { %v199_v34 = vmul.f32 0.125, %v197_v30  ;;  %v200_v35 = vmul.f32 %v198_v31, %v198_v31 }
 0x170   :  { %v201_v37 = vsub.f32 %v199_v34, %v200_v35 }
 0x172   :  { %v202_v39 = vmax.f32 %v201_v37, 0.0 }
 0x174   :  { %v205_v41 = vadd.f32 1e-05, %v202_v39 }
 0x176   :  { %296 = vrsqrt.f32 %v205_v41  ;;  %vm212_vm4 = vweird.f32 %v205_v41 }
 0x17c   :  { %v297_v42 = vpop.eup %296 }
 0x17d   :  { %v207_v43 = vmul.f32 %v297_v42, %v205_v41  ;;  %vm213_vm3 = vweird.f32 %v297_v42 }
 0x17e   :  { %vm214_vm5 = vmor %vm212_vm4, %vm213_vm3 }
 0x17f   :  { %v208_v44 = vmul.f32 %v297_v42, %v207_v43 }
 0x181   :  { %v209_v45 = vmul.f32 0.5, %v208_v44 }
 0x183   :  { %v210_v46 = vsub.f32 1.5, %v209_v45 }
 0x185   :  { %v211_v48 = vmul.f32 %v297_v42, %v210_v46 }
 0x187   :  { %v215_v49 = vsel %vm214_vm5, %v297_v42, %v211_v48 }
 0x188   :  { %v216_v50 = vmul.f32 %v286_v47, %v215_v49 }
 0x18a   :  { %v217_v51 = vmul.f32 %v216_v50, %v198_v31  ;;  %v222_v52 = vperm.slane %v216_v50, 0 }
 0x18c   :  { %v219_v53 = vrot.slane %v217_v51, 7  ;;  %v223_v55 = vmul.f32 %v222_v52, %v182_v11 }
 0x18e   :  { %v221_v54 = vsub.f32 %v286_v47, %v219_v53 }
 0x190   :  { %v224_v56 = vperm.slane %v221_v54, 1 }
 0x192   :  { %v225_v57 = vadd.f32 %v224_v56, %v223_v55 }
 0x194   :  { %v226_v58 = vmax.f32 %v225_v57, 0.0 }
 0x196   :  { %263 = vmatmul.f32.vlgmr.msra.gmra.mxu2 %v226_v58 }
 0x219   :  { %v264_v60 = vpop.f32.mrf.mxu2 }
 0x21a   :  { %v265_v61 = vadd.f32 %v293_v59, %v264_v60 }
 0x21c   :  { %267 = vst [vmem:[#allocation8] sm:$0xff] %v265_v61 }
 0x21d   :  { %278 = dma.vmem_to_hbm [thread:$0]  %s274_s3, 128, %s276_s21, [#allocation4]  }
 0x21e   :  { %398 = dma.done.wait [#allocation4], 128  }
 0x21f   :  { %399 = vsyncadd [#allocation4], 4294967168 }
 0x220   :  { %283 = vsyncpa [#allocation3], 1 }
 0x221   :  { %284 = vsyncpa [#allocation6], 1 }
 0x222   :  { %285 = vsyncpa [#allocation4], 1 }

</bundles_post_ra>
